<compile_context>
chip_gen: v6e
topology: v6e:2x2x1
jax: 0.10.0
libtpu: 0.0.40
codegen_flags: <defaults>
</compile_context>

<pallas_src>
import jax
import jax.numpy as jnp
from jax.experimental import pallas as pl
from jax.experimental.pallas import tpu as pltpu

_LANES = 128      # vreg lane width
_SUBLANES = 8     # vreg sublane count (f32)


def _copy_kernel(x_ref, o_ref):
    # Pure pass-through of the current (1, tile_rows, 128) lane-dense tile.
    o_ref[...] = x_ref[...]


def quad_approx_forward(parameter: jax.Array, spectrum: jax.Array):
    """Hot-path QuadApprox.forward(): a pure identity.

    The module's forward does zero arithmetic, so the fastest correct
    implementation launches no kernel and moves no bytes.
    """
    return parameter, spectrum


def quad_approx_forward_pallas(parameter: jax.Array, spectrum: jax.Array,
                               *, tile_rows: int = 256):
    """Structural Pallas version of QuadApprox.forward().

    Packs (parameter, spectrum) into one lane-dense (2, rows, 128) slab,
    runs a tiled, pipelined, input/output-aliased copy kernel, and unpacks
    back to the original 1-D shapes.
    """
    n = parameter.shape[0]
    assert spectrum.shape == (n,)
    assert parameter.dtype == spectrum.dtype
    dtype = parameter.dtype

    # --- lane-dense packing: (N,) -> (rows, 128), rows % 8 == 0 -------------
    rows = pl.cdiv(n, _LANES)
    rows = ((rows + _SUBLANES - 1) // _SUBLANES) * _SUBLANES
    tr = min(tile_rows, rows)
    tr = ((tr + _SUBLANES - 1) // _SUBLANES) * _SUBLANES
    rows = ((rows + tr - 1) // tr) * tr            # rows % tr == 0
    padded = rows * _LANES

    def to_slab(v):
        return jnp.pad(v, (0, padded - n)).reshape(rows, _LANES)

    # Fuse both tensors into a single input/output pair: (2, rows, 128).
    slab = jnp.stack([to_slab(parameter), to_slab(spectrum)])

    grid = (2, rows // tr)
    spec = pl.BlockSpec((1, tr, _LANES), lambda t, i: (t, i, 0))

    out = pl.pallas_call(
        _copy_kernel,
        grid=grid,
        in_specs=[spec],
        out_specs=spec,
        out_shape=jax.ShapeDtypeStruct((2, rows, _LANES), dtype),
        input_output_aliases={0: 0},            # output aliases the input slab
        compiler_params=pltpu.CompilerParams(
            dimension_semantics=("parallel", "parallel")),
    )(slab)

    flat = out.reshape(2, padded)
    return flat[0, :n], flat[1, :n]


if __name__ == "__main__":
    # Setup consistent with the module's __init__:
    # spectrum is a list of length 8; parameter is zeros of the same length.
    key = jax.random.PRNGKey(0)
    n = 8
    spectrum = jax.random.uniform(key, (n,), dtype=jnp.float32)  # spectrum list
    parameter = jnp.zeros((n,), dtype=jnp.float32)               # nn.Parameter init

    # Hot path (recommended): identity, no kernel launch.
    p_fast, s_fast = quad_approx_forward(parameter, spectrum)

    # Structural Pallas path: lane-dense, fused, aliased, pipelined copy.
    fwd = jax.jit(quad_approx_forward_pallas)
    p_out, s_out = fwd(parameter, spectrum)
    jax.block_until_ready((p_fast, s_fast, p_out, s_out))

    # Verify exact forward semantics on both paths.
    for p, s in ((p_fast, s_fast), (p_out, s_out)):
        assert p.shape == (n,) and p.dtype == jnp.float32
        assert s.shape == (n,) and s.dtype == jnp.float32
        assert bool(jnp.array_equal(p, parameter))
        assert bool(jnp.array_equal(s, spectrum))

    print("KERNEL_OK")
</pallas_src>

<mosaic_0001>
module attributes {stable_mosaic.version = 11 : i64} {
  func.func @_copy_kernel(%arg0: i32, %arg1: i32, %arg2: memref<1x8x128xf32, #tpu.memory_space<vmem>>, %arg3: memref<1x8x128xf32, #tpu.memory_space<vmem>>) attributes {dimension_semantics = [#tpu.dimension_semantics<parallel>, #tpu.dimension_semantics<parallel>], iteration_bounds = array<i64: 2, 1>, scalar_prefetch = 0 : i64, scratch_operands = 0 : i64, tpu.core_type = #tpu.core_type<tc>, window_params = [{transform_indices = @transform_0, window_bounds = array<i64: 1, 8, 128>}, {transform_indices = @transform_1, window_bounds = array<i64: 1, 8, 128>}]} {
    %c0 = arith.constant 0 : index
    %c0_0 = arith.constant 0 : index
    %c0_1 = arith.constant 0 : index
    %0 = vector.load %arg2[%c0, %c0_0, %c0_1] : memref<1x8x128xf32, #tpu.memory_space<vmem>>, vector<1x8x128xf32>
    %c0_2 = arith.constant 0 : index
    %c0_3 = arith.constant 0 : index
    %c0_4 = arith.constant 0 : index
    %1 = vector.load %arg3[%c0_2, %c0_3, %c0_4] : memref<1x8x128xf32, #tpu.memory_space<vmem>>, vector<1x8x128xf32>
    tpu.vector_store %arg3[%c0_2, %c0_3, %c0_4], %0 {strides = array<i32>} : memref<1x8x128xf32, #tpu.memory_space<vmem>>, vector<1x8x128xf32>,
    return
  }
  func.func @transform_0(%arg0: i32, %arg1: i32) -> (i32, i32, i32) {
    %c0_i32 = arith.constant 0 : i32
    %c0_i32_0 = arith.constant 0 : i32
    return %arg0, %arg1, %c0_i32 : i32, i32, i32
  }
  func.func @transform_1(%arg0: i32, %arg1: i32) -> (i32, i32, i32) {
    %c0_i32 = arith.constant 0 : i32
    %c0_i32_0 = arith.constant 0 : i32
    return %arg0, %arg1, %c0_i32 : i32, i32, i32
  }
}

</mosaic_0001>

<bundles_post_ra>
// kernel: quad_approx_forward_pallas.1
= control target key start
LH: loop header
LB: loop body
LE: loop exit
PB: predicated region body
PF: predicated region fallthrough
CT: control target
= control target key end

     0   :  { %s264_s6 = smov 0   ;;  %s268_s7 = smov 0   ;;  %s292_s0 = inlined_call_operand.vmem [shape: f32[2,8,128], index: 0, kind: input, shape index: {}, may-alias: {0,1}]   ;;  %s293_s1 = inlined_call_operand.vmem [shape: f32[2,8,128], index: 1, kind: output, shape index: {}, may-alias: {0,1}]  }
   0x1   :  { %s272_s8 = smov 0  }
   0x2 LB: > { %s23_s9 = sadd.s32 1, %s270_s7  ;;  %p223_p0 = scmp.ge.s32.totalorder %s274_s8, 1  ;;  %s274_s8 = sphi %s272_s8, %s11_s8   ;;  %s270_s7 = sphi %s268_s7, %s269_s7   ;;  %s266_s6 = sphi %s264_s6, %s265_s6  }
   0x3   : > { %p25_p1 = scmp.ge.s32.totalorder %s23_s9, 2  ;;  %p105_p2 = scmp.lt.s32.totalorder %s274_s8, 3 }
   0x5   : > { %s295_s9 = smov (%p25_p1, %s23_s9), 0  ;;  %p106_p3 = pnand %p223_p0, %p105_p2 }
   0x6   : > { %p129_p4 = scmp.lt.s32.totalorder (!%p106_p3), %s266_s6, 1 }
   0x7   : > { %109 = sbr.rel (%p106_p3) target bundleno = 17 (0x11), region = 24 }
   0xc   : > { %s297_s6 = smov (!%p129_p4, %s266_s6), 1 }
   0xd   : > { %s224_s10 = sshll.u32 %s297_s6, 3 }
   0xe   : > { %s135_s13 = scalar_lea.vmem %s292_s0, %s224_s10  ;;  %s142_s16 = scalar_lea.vmem %s293_s1, %s224_s10 }
   0xf   : > { %v143_v0 = vld [vmem:[%s135_s13] sm:$0xff] }
  0x10   : > { %144 = vst [vmem:[%s142_s16] sm:$0xff] %v143_v0 }
  0x11 PF: > { %s11_s8 = sadd.s32 1, %s274_s8   ;;  %s265_s6 = smov %s270_s7  }
  0x12   : > { %p8_p5 = scmp.ge.s32.totalorder %s11_s8, 4   ;;  %s269_s7 = smov %s295_s9  }
  0x14   :  { %10 = sbr.rel (!%p8_p5) target bundleno = 2 (0x2), region = 54 }

</bundles_post_ra>
